<compile_context>
chip_gen: v7x
topology: tpu7x:2x2x1
jax: 0.10.0
libtpu: 0.0.40
codegen_flags: <defaults>
</compile_context>

<pallas_src>
import jax
import jax.numpy as jnp
from jax.experimental import pallas as pl
from jax.experimental.pallas import tpu as pltpu

_LANE = 128
_CACHED_BUDGETS = None


def _budgets():
    """(block_budget_bytes, vmem_limit_bytes, max_tile) — generation aware."""
    global _CACHED_BUDGETS
    if _CACHED_BUDGETS is None:
        vmem_bytes = 64 * 1024 * 1024  # conservative (v7x-safe) default
        try:
            info = pltpu.get_tpu_info()
            vmem_bytes = int(getattr(info, "vmem_capacity_bytes", vmem_bytes))
        except Exception:
            pass
        if vmem_bytes >= 96 * 1024 * 1024:
            # v5e / v6e: 128 MiB physical VMEM -> bigger blocks, fewer steps.
            _CACHED_BUDGETS = (32 * 1024 * 1024, 64 * 1024 * 1024, 8192)
        else:
            # v7x: 64 MiB physical VMEM -> keep double-buffered blocks modest.
            _CACHED_BUDGETS = (16 * 1024 * 1024, 32 * 1024 * 1024, 2048)
    return _CACHED_BUDGETS


def _divisors(m):
    ds = set()
    d = 1
    while d * d <= m:
        if m % d == 0:
            ds.add(d)
            ds.add(m // d)
        d += 1
    return sorted(ds)


def _pick_tiling(n, c, hw, img_itemsize, noise_itemsize, budget, max_tile):
    """Return (tile, bn, hw_pad): lane tile, batch-block size, padded lane extent."""
    if hw < _LANE:
        # Small maps (4x4, 8x8): last block dim == full array dim is legal, so
        # no padding and no trailing slice at all.
        hw_pad = hw
        tiles = [hw]
    else:
        hw_pad = pl.cdiv(hw, _LANE) * _LANE
        m = hw_pad // _LANE
        tiles = sorted((d * _LANE for d in _divisors(m) if d * _LANE <= max_tile),
                       reverse=True)
        if not tiles:
            tiles = [_LANE]
    n_divs = sorted(_divisors(n), reverse=True)

    def block_bytes(tile, bn):
        # double-buffered image-in + noise-in + image-out blocks
        return 2 * (2 * bn * c * tile * img_itemsize + bn * tile * noise_itemsize)

    # Prefer the largest lane tile; fit the budget by shrinking the batch block
    # (bn) first rather than clamping the tile to 128.
    tile, bn = tiles[-1], 1
    for t in tiles:
        fitting = [b for b in n_divs if block_bytes(t, b) <= budget]
        if fitting:
            tile, bn = t, fitting[0]
            break

    # Keep >=4 grid steps when the problem allows it (double-buffering +
    # megacore/dual-TC sharding): split batch first, then shrink the lane tile.
    def steps(t, b):
        return (n // b) * (hw_pad // t)

    while steps(tile, bn) < 4 and bn > 1:
        bn = max(b for b in n_divs if b < bn)
    smaller_tiles = [t for t in tiles if t < tile]
    while steps(tile, bn) < 4 and smaller_tiles:
        tile = smaller_tiles[0]
        smaller_tiles = [t for t in tiles if t < tile]

    return tile, bn, hw_pad


def _noise_injection_kernel(w_ref, x_ref, n_ref, o_ref):
    # w_ref: (1, C, 1)  x_ref: (bn, C, T)  n_ref: (bn, 1, T)  o_ref: (bn, C, T)
    # Single fused pass: the image pass-through never round-trips through
    # another dtype; weight*noise is computed in the promoted dtype (f32 when
    # noise/weight are f32) and cast once before the add — the cast is free on
    # the VPU in this HBM-bound kernel.
    o_ref[...] = x_ref[...] + (w_ref[...] * n_ref[...]).astype(o_ref.dtype)


@jax.jit
def noise_injection(image, weight, noise):
    """image: (N, C, H, W), weight: broadcastable to (1, C, 1, 1), noise: (N, 1, H, W)."""
    n, c, h, w = image.shape
    hw = h * w
    img_item = jnp.dtype(image.dtype).itemsize
    noise_item = jnp.dtype(noise.dtype).itemsize

    weight = jnp.reshape(weight, (1, c, 1))          # keep native dtype; cast in-kernel
    x_flat = image.reshape(n, c, hw)
    nz_flat = noise.reshape(n, 1, hw)                # NO wrapper astype (in-kernel cast)

    budget, vmem_limit, max_tile = _budgets()
    tile, bn, hw_pad = _pick_tiling(n, c, hw, img_item, noise_item, budget, max_tile)

    if hw_pad != hw:
        # Only taken for H*W that is >=128 and not a multiple of 128 (rare for
        # StyleGAN); pad only up to the next 128 boundary, never a full tile.
        pad = hw_pad - hw
        x_flat = jnp.pad(x_flat, ((0, 0), (0, 0), (0, pad)))
        nz_flat = jnp.pad(nz_flat, ((0, 0), (0, 0), (0, pad)))

    # TODO(synk): enable input_output_aliases={1: 0} when callers donate `image`.
    out_flat = pl.pallas_call(
        _noise_injection_kernel,
        out_shape=jax.ShapeDtypeStruct((n, c, hw_pad), image.dtype),
        grid_spec=pltpu.PrefetchScalarGridSpec(
            num_scalar_prefetch=0,
            grid=(n // bn, hw_pad // tile),
            in_specs=[
                pl.BlockSpec((1, c, 1), lambda b, i: (0, 0, 0)),       # weight: tiny, resident
                pl.BlockSpec((bn, c, tile), lambda b, i: (b, 0, i)),   # image
                pl.BlockSpec((bn, 1, tile), lambda b, i: (b, 0, i)),   # noise
            ],
            out_specs=pl.BlockSpec((bn, c, tile), lambda b, i: (b, 0, i)),
        ),
        compiler_params=pltpu.CompilerParams(
            dimension_semantics=("parallel", "parallel"),
            vmem_limit_bytes=vmem_limit,
        ),
        cost_estimate=pl.CostEstimate(
            flops=2 * n * c * hw_pad,
            transcendentals=0,
            bytes_accessed=(2 * n * c * hw_pad * img_item
                            + n * hw_pad * noise_item
                            + c * jnp.dtype(weight.dtype).itemsize),
        ),
    )(weight, x_flat, nz_flat)

    if hw_pad != hw:
        out_flat = out_flat[:, :, :hw]
    return out_flat.reshape(n, c, h, w)


class NoiseInjection:
    """JAX/Pallas port of the PyTorch NoiseInjection module's forward pass."""

    def __init__(self, channel, dtype=jnp.float32):
        # Matches nn.Parameter(torch.zeros(1, channel, 1, 1)).
        self.weight = jnp.zeros((1, channel, 1, 1), dtype=dtype)
        self.noise = None

    def __call__(self, image, noise=None, *, key=None):
        if noise is None and self.noise is None:
            # torch.randn default noise -> explicit-key jax.random.normal.
            assert key is not None, "pass key= to sample default noise"
            noise = jax.random.normal(
                key, (image.shape[0], 1, image.shape[2], image.shape[3]),
                dtype=image.dtype)
        elif noise is None:
            noise = self.noise
        return noise_injection(image, self.weight, noise)


if __name__ == "__main__":
    key = jax.random.PRNGKey(0)
    k_img, k_noise, k_w = jax.random.split(key, 3)

    # 1) Main path: 128-multiple spatial extent, divisible tile, no padding.
    N, C, H, W = 2, 4, 16, 16
    image = jax.random.normal(k_img, (N, C, H, W), dtype=jnp.float32)
    noise = jax.random.normal(k_noise, (N, 1, H, W), dtype=jnp.float32)
    weight = jax.random.normal(k_w, (1, C, 1, 1), dtype=jnp.float32)
    out = jax.block_until_ready(noise_injection(image, weight, noise))
    ref = image + weight * noise
    assert out.shape == (N, C, H, W)
    assert jnp.allclose(out, ref, atol=1e-6, rtol=1e-6)

    # 2) Tiny-spatial path (hw < 128): full-extent lane block, no pad/slice,
    #    plus the default zero-weight module behaviour (output == input).
    layer = NoiseInjection(C)
    img_small = jax.random.normal(k_img, (N, C, 4, 4), dtype=jnp.float32)
    out_small = jax.block_until_ready(layer(img_small, key=k_noise))
    assert out_small.shape == (N, C, 4, 4)
    assert jnp.allclose(out_small, img_small, atol=1e-6)

    # 3) Non-multiple-of-128 spatial extent (12x12): minimal pad-to-128 path.
    img_odd = jax.random.normal(k_img, (N, C, 12, 12), dtype=jnp.float32)
    nz_odd = jax.random.normal(k_noise, (N, 1, 12, 12), dtype=jnp.float32)
    out_odd = jax.block_until_ready(noise_injection(img_odd, weight, nz_odd))
    assert jnp.allclose(out_odd, img_odd + weight * nz_odd, atol=1e-6, rtol=1e-6)

    # 4) Mixed precision: bf16 image, f32 noise/weight -> in-kernel cast.
    img_bf16 = image.astype(jnp.bfloat16)
    out_bf16 = jax.block_until_ready(noise_injection(img_bf16, weight, noise))
    ref_bf16 = img_bf16 + (weight * noise).astype(jnp.bfloat16)
    assert out_bf16.dtype == jnp.bfloat16
    assert jnp.allclose(out_bf16.astype(jnp.float32),
                        ref_bf16.astype(jnp.float32), atol=1e-2, rtol=1e-2)

    print("KERNEL_OK")
</pallas_src>

<mosaic_0001>
module attributes {stable_mosaic.version = 11 : i64} {
  func.func @_noise_injection_kernel(%arg0: i32, %arg1: i32, %arg2: memref<1x4x1xf32, #tpu.memory_space<vmem>>, %arg3: memref<1x4x128xf32, #tpu.memory_space<vmem>>, %arg4: memref<1x1x128xf32, #tpu.memory_space<vmem>>, %arg5: memref<1x4x128xf32, #tpu.memory_space<vmem>>) attributes {dimension_semantics = [#tpu.dimension_semantics<parallel>, #tpu.dimension_semantics<parallel>], iteration_bounds = array<i64: 2, 2>, scalar_prefetch = 0 : i64, scratch_operands = 0 : i64, tpu.core_type = #tpu.core_type<tc>, window_params = [{pipeline_mode = #tpu.pipeline_mode<synchronous>, transform_indices = @transform_0, window_bounds = array<i64: 1, 4, 1>}, {transform_indices = @transform_1, window_bounds = array<i64: 1, 4, 128>}, {transform_indices = @transform_2, window_bounds = array<i64: 1, 1, 128>}, {transform_indices = @transform_3, window_bounds = array<i64: 1, 4, 128>}]} {
    %c0 = arith.constant 0 : index
    %c0_0 = arith.constant 0 : index
    %c0_1 = arith.constant 0 : index
    %0 = vector.load %arg3[%c0, %c0_0, %c0_1] : memref<1x4x128xf32, #tpu.memory_space<vmem>>, vector<1x4x128xf32>
    %c0_2 = arith.constant 0 : index
    %c0_3 = arith.constant 0 : index
    %c0_4 = arith.constant 0 : index
    %1 = vector.load %arg2[%c0_2, %c0_3, %c0_4] : memref<1x4x1xf32, #tpu.memory_space<vmem>>, vector<1x4x1xf32>
    %c0_5 = arith.constant 0 : index
    %c0_6 = arith.constant 0 : index
    %c0_7 = arith.constant 0 : index
    %2 = vector.load %arg4[%c0_5, %c0_6, %c0_7] : memref<1x1x128xf32, #tpu.memory_space<vmem>>, vector<1x1x128xf32>
    %3 = vector.broadcast %1 : vector<1x4x1xf32> to vector<1x4x128xf32>
    %4 = vector.broadcast %2 : vector<1x1x128xf32> to vector<1x4x128xf32>
    %5 = arith.mulf %3, %4 : vector<1x4x128xf32>
    %6 = arith.addf %0, %5 : vector<1x4x128xf32>
    %c0_8 = arith.constant 0 : index
    %c0_9 = arith.constant 0 : index
    %c0_10 = arith.constant 0 : index
    %7 = vector.load %arg5[%c0_8, %c0_9, %c0_10] : memref<1x4x128xf32, #tpu.memory_space<vmem>>, vector<1x4x128xf32>
    tpu.vector_store %arg5[%c0_8, %c0_9, %c0_10], %6 {strides = array<i32>} : memref<1x4x128xf32, #tpu.memory_space<vmem>>, vector<1x4x128xf32>,
    return
  }
  func.func @transform_0(%arg0: i32, %arg1: i32) -> (i32, i32, i32) {
    %c0_i32 = arith.constant 0 : i32
    %c0_i32_0 = arith.constant 0 : i32
    %c0_i32_1 = arith.constant 0 : i32
    %c0_i32_2 = arith.constant 0 : i32
    return %c0_i32, %c0_i32_0, %c0_i32_1 : i32, i32, i32
  }
  func.func @transform_1(%arg0: i32, %arg1: i32) -> (i32, i32, i32) {
    %c0_i32 = arith.constant 0 : i32
    %c0_i32_0 = arith.constant 0 : i32
    return %arg0, %c0_i32, %arg1 : i32, i32, i32
  }
  func.func @transform_2(%arg0: i32, %arg1: i32) -> (i32, i32, i32) {
    %c0_i32 = arith.constant 0 : i32
    %c0_i32_0 = arith.constant 0 : i32
    return %arg0, %c0_i32, %arg1 : i32, i32, i32
  }
  func.func @transform_3(%arg0: i32, %arg1: i32) -> (i32, i32, i32) {
    %c0_i32 = arith.constant 0 : i32
    %c0_i32_0 = arith.constant 0 : i32
    return %arg0, %c0_i32, %arg1 : i32, i32, i32
  }
}

</mosaic_0001>

<bundles_post_ra>
// kernel: noise_injection.1
= control target key start
LH: loop header
LB: loop body
LE: loop exit
PB: predicated region body
PF: predicated region fallthrough
CT: control target
= control target key end

     0   :  { %s464_s12 = smov 0   ;;  %s466_s13 = smov 0   ;;  %s518_s0 = inlined_call_operand.vmem [shape: f32[1,4,1], index: 0, kind: input, shape index: {}]   ;;  %s519_s1 = inlined_call_operand.vmem [shape: f32[2,4,256], index: 1, kind: input, shape index: {}]   ;;  %s520_s2 = inlined_call_operand.vmem [shape: f32[2,1,256], index: 2, kind: input, shape index: {}]   ;;  %s521_s3 = inlined_call_operand.vmem [shape: f32[2,4,256], index: 3, kind: output, shape index: {}]  }
   0x1   :  { %s468_s14 = smov 0   ;;  %s470_s15 = smov 0  }
   0x2   :  { %s472_s16 = smov 0  }
   0x3 LB: > { %s22_s17 = sadd.s32 1, %s433_s14  ;;  %s25_s18 = sadd.s32 1, %s437_s15  ;;  %s441_s16 = sphi %s472_s16, %s13_s16   ;;  %s437_s15 = sphi %s470_s15, %s525_s15   ;;  %s433_s14 = sphi %s468_s14, %s524_s14   ;;  %s429_s13 = sphi %s466_s13, %s523_s13   ;;  %s425_s12 = sphi %s464_s12, %s522_s12  }
   0x4   : > { %p23_p0 = scmp.ge.s32.totalorder %s22_s17, 2  ;;  %p352_p1 = scmp.ge.s32.totalorder %s441_s16, 1 }
   0x5   : > { %p170_p2 = scmp.lt.s32.totalorder %s441_s16, 5 }
   0x6   : > { %s527_s17 = smov (%p23_p0, %s22_s17), 0  ;;  %s529_s18 = smov (!%p23_p0, %s25_s18), %s437_s15 }
   0x7   : > { %p171_p3 = pnand %p352_p1, %p170_p2  ;;  %p27_p4 = scmp.ge.s32.totalorder %s529_s18, 2 }
   0x8   : > { %v231_v0 = vld [vmem:[%s518_s0] sm:$0xf] (!%p171_p3)  ;;  %v443_v1 = vmov (!%p171_p3), 0   ;;  %p207_p5 = scmp.lt.s32.totalorder (!%p171_p3), %s429_s13, 1  ;;  %p209_p6 = scmp.lt.s32.totalorder (!%p171_p3), %s425_s12, 1 }
   0x9   : > { %s531_s18 = smov (%p27_p4, %s529_s18), 0  ;;  %174 = sbr.rel (%p171_p3) target bundleno = 144 (0x90), region = 32 }
   0xa   : > { %402 = vset.pattern.permute.xlu0 (!%p171_p3), %v443_v1 }
   0xb   : > { %235 = vperm.xlu0 (!%p171_p3), %402, %v231_v0  }
  0x10   : > { %s533_s13 = smov (!%p207_p5, %s429_s13), 1  ;;  %s535_s12 = smov (!%p209_p6, %s425_s12), 1 }
  0x11   : > { %s353_s21 = sshll.u32 %s533_s13, 1 }
  0x12   : > { %s212_s22 = sadd.s32 %s353_s21, %s535_s12 }
  0x13   : > { %s354_s23 = sshll.u32 %s212_s22, 2  ;;  %s221_s26 = scalar_lea.vmem %s520_s2, %s212_s22 }
  0x14   : > { %s214_s29 = scalar_lea.vmem %s519_s1, %s354_s23  ;;  %v358_v2 = vld [vmem:[%s221_s26] ss:$0 sm:$0xff]  ;;  %s229_s5 = scalar_lea.vmem %s521_s3, %s354_s23 }
  0x15   : > { %v230_v4 = vld [vmem:[%s214_s29] sm:$0xf] }
  0x8a   : > { %v236_v3 = vpop.permute.xlu0 %235 }
  0x8b   : > { %v244_v5 = vmul.f32 %v358_v2, %v236_v3 }
  0x8d   : > { %v245_v6 = vadd.f32 %v244_v5, %v230_v4 }
  0x8f   : > { %246 = vst [vmem:[%s229_s5] sm:$0xf] %v245_v6 }
  0x90 PF: > { %s13_s16 = sadd.s32 1, %s441_s16   ;;  %s522_s12 = smov %s433_s14 }
  0x91   : > { %p10_p7 = scmp.ge.s32.totalorder %s13_s16, 6   ;;  %s523_s13 = smov %s437_s15 }
  0x92   : > { %s524_s14 = smov %s527_s17  ;;  %s525_s15 = smov %s531_s18 }
  0x93   :  { %12 = sbr.rel (!%p10_p7) target bundleno = 3 (0x3), region = 65 }

</bundles_post_ra>
